<compile_context>
chip_gen: v7x
topology: tpu7x:2x2x1
jax: 0.10.0
libtpu: 0.0.40
codegen_flags: <defaults>
</compile_context>

<pallas_src>
import jax
import jax.numpy as jnp
from jax.experimental import pallas as pl
from jax.experimental.pallas import tpu as pltpu


def _round_up(x, m):
    return ((x + m - 1) // m) * m


def _cdiv(a, b):
    return (a + b - 1) // b


# ----------------------------- Pallas kernel ------------------------------ #

def tgcn_kernel(a_ref, xw_ref, h_ref,
                wzc_ref, wrc_ref, whc_ref,
                lz2_ref, lr2_ref, lh2_ref,
                bz_ref, br_ref, bh_ref,
                wy_ref, hsel_ref, by_ref,
                out_ref, acc_ref):
    """One (row-tile m, contraction-tile k) grid step of the fused TGCN cell."""
    k = pl.program_id(1)

    # --- K-tiled aggregation: acc += A_tile @ XW_tile (f32 accumulation) ---
    @pl.when(k == 0)
    def _():
        acc_ref[...] = jnp.zeros_like(acc_ref)

    acc_ref[...] += jnp.dot(a_ref[...], xw_ref[...],
                            preferred_element_type=jnp.float32)

    # --- gates + packed output only on the last k step (output block is per row tile) ---
    @pl.when(k == pl.num_programs(1) - 1)
    def _():
        conv = acc_ref[...]                       # (T, 3Hd) f32 = [conv_z | conv_r | conv_h]
        H = h_ref[...]                            # (T, Hd)  f32

        # Each gate pre-activation from its own final-width dot -> no intra-vreg lane slices.
        z = jax.nn.sigmoid(
            jnp.dot(conv, wzc_ref[...], preferred_element_type=jnp.float32)
            + jnp.dot(H, lz2_ref[...], preferred_element_type=jnp.float32)
            + bz_ref[...])
        r = jax.nn.sigmoid(
            jnp.dot(conv, wrc_ref[...], preferred_element_type=jnp.float32)
            + jnp.dot(H, lr2_ref[...], preferred_element_type=jnp.float32)
            + br_ref[...])
        h_tilde = jnp.tanh(
            jnp.dot(conv, whc_ref[...], preferred_element_type=jnp.float32)
            + jnp.dot(H * r, lh2_ref[...], preferred_element_type=jnp.float32)
            + bh_ref[...])

        h_new = z * H + (1.0 - z) * h_tilde       # (T, Hd)

        # Lane-dense packed output slab (T, OUT_W >= 128):
        #   cols [0, F)      : y = relu(h_new) @ W_lin + b_lin
        #   cols [F, F + Hd) : h_new (via identity-selector matmul) -> one unmasked store.
        out_ref[...] = (
            jnp.dot(jnp.maximum(h_new, 0.0), wy_ref[...],
                    preferred_element_type=jnp.float32)
            + jnp.dot(h_new, hsel_ref[...], preferred_element_type=jnp.float32)
            + by_ref[...])


# ------------------------------ JAX wrapper ------------------------------- #

def build_norm_adj(edge_index, edge_weight, num_nodes):
    """GCN normalization (add_self_loops=False): A_norm[c, r] = d_r^-1/2 w d_c^-1/2."""
    row, col = edge_index[0], edge_index[1]
    deg = jnp.zeros((num_nodes,), jnp.float32).at[col].add(edge_weight)
    dinv = jnp.where(deg > 0.0, jax.lax.rsqrt(jnp.maximum(deg, 1e-30)), 0.0)
    norm = dinv[row] * edge_weight * dinv[col]
    A = jnp.zeros((num_nodes, num_nodes), jnp.float32).at[col, row].add(norm)
    return A


def _vmem_capacity_bytes():
    try:
        return int(pltpu.get_tpu_info().vmem_capacity_bytes)   # 128 MiB v5e/v6e, 64 MiB v7x
    except Exception:
        return 64 * 1024 * 1024                                # conservative fallback (v7x)


def _select_tiles(n_rows, k_cols128, cd_bytes, out_w, vmem_budget, tile_rows):
    """Pick (tile_m, tile_k, a_buffers) so the whole working set fits vmem_budget."""
    def need(tm, tk, a_buf):
        a = a_buf * tm * tk * cd_bytes            # A tiles (the streamed O(N^2) term)
        xw = 2 * tk * 128 * cd_bytes              # XW k-tile (3Hd lane-padded to 128)
        h = 2 * tm * 128 * 4                      # H row tile (Hd lane-padded to 128)
        out = 2 * tm * out_w * 4                  # packed output slab
        acc = tm * 128 * 4                        # f32 accumulator scratch
        weights = 2 * 1024 * 1024                 # resident gate weights + compiler slack
        return a + xw + h + out + acc + weights

    tm = max(8, min(_round_up(max(tile_rows, 1), 8), _round_up(n_rows, 8)))
    tk = k_cols128
    while need(tm, tk, 2) > vmem_budget:
        if tk > 1024:                             # prefer K-tiling first: keeps row tiles big
            tk = _round_up(tk // 2, 128)
        elif tm > 512:
            tm = _round_up(tm // 2, 8)
        elif tk > 128:
            tk = _round_up(tk // 2, 128)
        elif tm > 8:
            tm = _round_up(tm // 2, 8)
        else:
            break
    nk = _cdiv(k_cols128, tk)
    tk = _round_up(_cdiv(k_cols128, nk), 128)     # rebalance -> minimal column over-padding
    a_buf = 3 if (nk > 1 and tm * tk * cd_bytes <= (2 << 20)
                  and need(tm, tk, 3) <= vmem_budget) else 2
    return tm, tk, a_buf


def pygt_tgcn_forward(edge_index, node_feat, edge_weight, hidden_state, params,
                      *, compute_dtype=jnp.bfloat16, tile_rows=512):
    """Fused TGCN cell + ReLU + Linear forward. Returns (y, h_new), both f32."""
    N, F = node_feat.shape
    Hd = hidden_state.shape[1]
    f32 = jnp.float32

    A = build_norm_adj(edge_index, edge_weight, N)

    # ---- trace-time fusion (constant-folded under jit) ----
    # Hoisted feature transform: XW = X @ [Wz|Wr|Wh] done once here, not per grid step.
    wg = jnp.concatenate([params["wz"], params["wr"], params["wh"]], axis=1)      # (F, 3Hd)
    xw = node_feat.astype(f32) @ wg                                               # (N, 3Hd)

    zero = jnp.zeros((Hd, Hd), f32)
    wzc = jnp.concatenate([params["lz1"], zero, zero], axis=0)                    # (3Hd, Hd)
    wrc = jnp.concatenate([zero, params["lr1"], zero], axis=0)
    whc = jnp.concatenate([zero, zero, params["lh1"]], axis=0)
    # GCN biases folded through the gate weights -> exactly one bias add per gate.
    bz = params["bz"] @ params["lz1"] + params["lzb"]                             # (1, Hd)
    br = params["br"] @ params["lr1"] + params["lrb"]
    bh = params["bh"] @ params["lh1"] + params["lhb"]

    # Packed, lane-dense output slab layout: [ y (F) | h_new (Hd) | zero pad ] -> OUT_W lanes.
    OUT_W = _round_up(F + Hd, 128)
    wy = jnp.zeros((Hd, OUT_W), f32).at[:, :F].set(params["lw"])
    hsel = jnp.zeros((Hd, OUT_W), f32).at[jnp.arange(Hd), F + jnp.arange(Hd)].set(1.0)
    by = jnp.zeros((1, OUT_W), f32).at[:, :F].set(params["lb"])

    # ---- generation-aware tiling (A is the O(N^2) HBM-bound stream) ----
    cd_bytes = jnp.dtype(compute_dtype).itemsize
    vmem_cap = _vmem_capacity_bytes()
    vmem_limit = int(vmem_cap * 0.75)              # ~48 MiB on v7x, ~96 MiB on v5e/v6e
    K128 = _round_up(max(N, 128), 128)             # columns 128-aligned, NOT row-tile-aligned
    tile_m, tile_k, a_buf = _select_tiles(N, K128, cd_bytes, OUT_W,
                                          vmem_limit - (4 << 20), tile_rows)
    nk = _cdiv(K128, tile_k)
    K_pad = nk * tile_k
    nm = _cdiv(_round_up(N, 8), tile_m)
    N_pad = nm * tile_m

    A_p = jnp.zeros((N_pad, K_pad), compute_dtype).at[:N, :N].set(A.astype(compute_dtype))
    XW_p = jnp.zeros((K_pad, 3 * Hd), compute_dtype).at[:N, :].set(xw.astype(compute_dtype))
    H_p = jnp.zeros((N_pad, Hd), f32).at[:N, :].set(hidden_state.astype(f32))

    row_map = lambda m, k: (m, 0)
    full_map = lambda m, k: (0, 0)
    a_spec_kwargs = {}
    if a_buf != 2:                                 # deeper A buffering only when K-tiled small
        a_spec_kwargs["pipeline_mode"] = pl.Buffered(a_buf)
    a_spec = pl.BlockSpec((tile_m, tile_k), lambda m, k: (m, k), **a_spec_kwargs)

    packed = pl.pallas_call(
        tgcn_kernel,
        out_shape=jax.ShapeDtypeStruct((N_pad, OUT_W), f32),
        grid=(nm, nk),
        in_specs=[
            a_spec,                                               # A row x k tile (streamed)
            pl.BlockSpec((tile_k, 3 * Hd), lambda m, k: (k, 0)),  # XW k-tile
            pl.BlockSpec((tile_m, Hd), row_map),                  # H row tile
            pl.BlockSpec((3 * Hd, Hd), full_map),                 # conv->Z selector (lz1)
            pl.BlockSpec((3 * Hd, Hd), full_map),                 # conv->R selector (lr1)
            pl.BlockSpec((3 * Hd, Hd), full_map),                 # conv->H selector (lh1)
            pl.BlockSpec((Hd, Hd), full_map),                     # lz2
            pl.BlockSpec((Hd, Hd), full_map),                     # lr2
            pl.BlockSpec((Hd, Hd), full_map),                     # lh2
            pl.BlockSpec((1, Hd), full_map),                      # fused Z bias
            pl.BlockSpec((1, Hd), full_map),                      # fused R bias
            pl.BlockSpec((1, Hd), full_map),                      # fused H bias
            pl.BlockSpec((Hd, OUT_W), full_map),                  # padded final Linear weight
            pl.BlockSpec((Hd, OUT_W), full_map),                  # identity selector for h_new
            pl.BlockSpec((1, OUT_W), full_map),                   # padded final Linear bias
        ],
        out_specs=pl.BlockSpec((tile_m, OUT_W), row_map),
        scratch_shapes=[pltpu.VMEM((tile_m, 3 * Hd), f32)],
        compiler_params=pltpu.CompilerParams(
            dimension_semantics=("parallel", "arbitrary"),        # row tiles split across TCs
            vmem_limit_bytes=vmem_limit),
    )(A_p, XW_p, H_p, wzc, wrc, whc,
      params["lz2"], params["lr2"], params["lh2"],
      bz, br, bh, wy, hsel, by)

    # Padded rows N..N_pad-1 hold bias-only garbage -> always slice before reuse/feedback.
    y = packed[:N, :F]
    h_new = packed[:N, F:F + Hd]
    return y, h_new


# ---------------------------- reference (JAX) ------------------------------ #

def reference_forward(edge_index, node_feat, edge_weight, hidden_state, params):
    A = build_norm_adj(edge_index, edge_weight, node_feat.shape[0])
    H = hidden_state

    def gcn(w, b):
        return A @ (node_feat @ w) + b

    cz = gcn(params["wz"], params["bz"])
    cr = gcn(params["wr"], params["br"])
    ch = gcn(params["wh"], params["bh"])
    Z = jax.nn.sigmoid(cz @ params["lz1"] + H @ params["lz2"] + params["lzb"])
    R = jax.nn.sigmoid(cr @ params["lr1"] + H @ params["lr2"] + params["lrb"])
    Ht = jnp.tanh(ch @ params["lh1"] + (H * R) @ params["lh2"] + params["lhb"])
    Hn = Z * H + (1.0 - Z) * Ht
    y = jnp.maximum(Hn, 0.0) @ params["lw"] + params["lb"]
    return y, Hn


# --------------------------------- main ------------------------------------ #

if __name__ == "__main__":
    N, F, Hd = 16, 4, 32   # nodes, node_features, num_hidden_units

    key = jax.random.PRNGKey(0)
    ks = jax.random.split(key, 24)

    def w(k, shape, scale=0.1):
        return (scale * jax.random.normal(k, shape)).astype(jnp.float32)

    params = {
        # GCNConv weights (F, Hd) and biases (1, Hd)
        "wz": w(ks[0], (F, Hd)), "bz": w(ks[1], (1, Hd)),
        "wr": w(ks[2], (F, Hd)), "br": w(ks[3], (1, Hd)),
        "wh": w(ks[4], (F, Hd)), "bh": w(ks[5], (1, Hd)),
        # linear_z / linear_r / linear_h: Linear(2*Hd, Hd) split into two (Hd, Hd) halves
        "lz1": w(ks[6], (Hd, Hd)), "lz2": w(ks[7], (Hd, Hd)), "lzb": w(ks[8], (1, Hd)),
        "lr1": w(ks[9], (Hd, Hd)), "lr2": w(ks[10], (Hd, Hd)), "lrb": w(ks[11], (1, Hd)),
        "lh1": w(ks[12], (Hd, Hd)), "lh2": w(ks[13], (Hd, Hd)), "lhb": w(ks[14], (1, Hd)),
        # final Linear(Hd, F)
        "lw": w(ks[15], (Hd, F)), "lb": w(ks[16], (1, F)),
    }

    # Small deterministic graph: ring + a few random edges.
    src = jnp.arange(N, dtype=jnp.int32)
    dst = (src + 1) % N
    extra_src = jax.random.randint(ks[17], (8,), 0, N, dtype=jnp.int32)
    extra_dst = jax.random.randint(ks[18], (8,), 0, N, dtype=jnp.int32)
    edge_index = jnp.stack([jnp.concatenate([src, extra_src]),
                            jnp.concatenate([dst, extra_dst])], axis=0)
    edge_weight = jax.random.uniform(ks[19], (edge_index.shape[1],),
                                     minval=0.5, maxval=1.5).astype(jnp.float32)

    node_feat = w(ks[20], (N, F), scale=1.0)
    hidden_state = w(ks[21], (N, Hd), scale=1.0)

    y_ref, h_ref = reference_forward(edge_index, node_feat, edge_weight, hidden_state, params)

    # f32 path: tight check against the reference.
    y, h = pygt_tgcn_forward(edge_index, node_feat, edge_weight, hidden_state, params,
                             compute_dtype=jnp.float32)
    jax.block_until_ready((y, h))
    assert jnp.allclose(y, y_ref, atol=1e-4, rtol=1e-4)
    assert jnp.allclose(h, h_ref, atol=1e-4, rtol=1e-4)

    # Default bf16 aggregation path (A / XW in bf16, f32 MXU accumulation): loose check.
    y16, h16 = pygt_tgcn_forward(edge_index, node_feat, edge_weight, hidden_state, params,
                                 compute_dtype=jnp.bfloat16)
    jax.block_until_ready((y16, h16))
    assert jnp.allclose(y16, y_ref, atol=1e-1, rtol=1e-1)
    assert jnp.allclose(h16, h_ref, atol=1e-1, rtol=1e-1)

    print("KERNEL_OK")
</pallas_src>

<mosaic_0001>
module attributes {stable_mosaic.version = 11 : i64} {
  func.func @tgcn_kernel(%arg0: i32, %arg1: i32, %arg2: memref<16x128xf32, #tpu.memory_space<vmem>>, %arg3: memref<128x96xf32, #tpu.memory_space<vmem>>, %arg4: memref<16x32xf32, #tpu.memory_space<vmem>>, %arg5: memref<96x32xf32, #tpu.memory_space<vmem>>, %arg6: memref<96x32xf32, #tpu.memory_space<vmem>>, %arg7: memref<96x32xf32, #tpu.memory_space<vmem>>, %arg8: memref<32x32xf32, #tpu.memory_space<vmem>>, %arg9: memref<32x32xf32, #tpu.memory_space<vmem>>, %arg10: memref<32x32xf32, #tpu.memory_space<vmem>>, %arg11: memref<1x32xf32, #tpu.memory_space<vmem>>, %arg12: memref<1x32xf32, #tpu.memory_space<vmem>>, %arg13: memref<1x32xf32, #tpu.memory_space<vmem>>, %arg14: memref<32x128xf32, #tpu.memory_space<vmem>>, %arg15: memref<32x128xf32, #tpu.memory_space<vmem>>, %arg16: memref<1x128xf32, #tpu.memory_space<vmem>>, %arg17: memref<16x128xf32, #tpu.memory_space<vmem>>, %arg18: memref<16x96xf32, #tpu.memory_space<vmem>>) attributes {dimension_semantics = [#tpu.dimension_semantics<parallel>, #tpu.dimension_semantics<arbitrary>], iteration_bounds = array<i64: 1, 1>, scalar_prefetch = 0 : i64, scratch_operands = 1 : i64, tpu.core_type = #tpu.core_type<tc>, window_params = [{transform_indices = @transform_0, window_bounds = array<i64: 16, 128>}, {transform_indices = @transform_1, window_bounds = array<i64: 128, 96>}, {transform_indices = @transform_2, window_bounds = array<i64: 16, 32>}, {pipeline_mode = #tpu.pipeline_mode<synchronous>, transform_indices = @transform_3, window_bounds = array<i64: 96, 32>}, {pipeline_mode = #tpu.pipeline_mode<synchronous>, transform_indices = @transform_4, window_bounds = array<i64: 96, 32>}, {pipeline_mode = #tpu.pipeline_mode<synchronous>, transform_indices = @transform_5, window_bounds = array<i64: 96, 32>}, {pipeline_mode = #tpu.pipeline_mode<synchronous>, transform_indices = @transform_6, window_bounds = array<i64: 32, 32>}, {pipeline_mode = #tpu.pipeline_mode<synchronous>, transform_indices = @transform_7, window_bounds = array<i64: 32, 32>}, {pipeline_mode = #tpu.pipeline_mode<synchronous>, transform_indices = @transform_8, window_bounds = array<i64: 32, 32>}, {pipeline_mode = #tpu.pipeline_mode<synchronous>, transform_indices = @transform_9, window_bounds = array<i64: 1, 32>}, {pipeline_mode = #tpu.pipeline_mode<synchronous>, transform_indices = @transform_10, window_bounds = array<i64: 1, 32>}, {pipeline_mode = #tpu.pipeline_mode<synchronous>, transform_indices = @transform_11, window_bounds = array<i64: 1, 32>}, {pipeline_mode = #tpu.pipeline_mode<synchronous>, transform_indices = @transform_12, window_bounds = array<i64: 32, 128>}, {pipeline_mode = #tpu.pipeline_mode<synchronous>, transform_indices = @transform_13, window_bounds = array<i64: 32, 128>}, {pipeline_mode = #tpu.pipeline_mode<synchronous>, transform_indices = @transform_14, window_bounds = array<i64: 1, 128>}, {transform_indices = @transform_15, window_bounds = array<i64: 16, 128>}]} {
    %c0_i32 = arith.constant 0 : i32
    %0 = arith.cmpi eq, %arg1, %c0_i32 : i32
    %1 = arith.extui %0 : i1 to i32
    %c0_i32_0 = arith.constant 0 : i32
    %2 = arith.cmpi ne, %1, %c0_i32_0 : i32
    scf.if %2 {
      %cst_10 = arith.constant 0.000000e+00 : f32
      %12 = vector.broadcast %cst_10 : f32 to vector<16x96xf32>
      %c0_11 = arith.constant 0 : index
      %c0_12 = arith.constant 0 : index
      %13 = vector.load %arg18[%c0_11, %c0_12] : memref<16x96xf32, #tpu.memory_space<vmem>>, vector<16x96xf32>
      tpu.vector_store %arg18[%c0_11, %c0_12], %12 {strides = array<i32>} : memref<16x96xf32, #tpu.memory_space<vmem>>, vector<16x96xf32>,
    } else {
    }
    %c0 = arith.constant 0 : index
    %c0_1 = arith.constant 0 : index
    %3 = vector.load %arg18[%c0, %c0_1] : memref<16x96xf32, #tpu.memory_space<vmem>>, vector<16x96xf32>
    %c0_2 = arith.constant 0 : index
    %c0_3 = arith.constant 0 : index
    %4 = vector.load %arg2[%c0_2, %c0_3] : memref<16x128xf32, #tpu.memory_space<vmem>>, vector<16x128xf32>
    %c0_4 = arith.constant 0 : index
    %c0_5 = arith.constant 0 : index
    %5 = vector.load %arg3[%c0_4, %c0_5] : memref<128x96xf32, #tpu.memory_space<vmem>>, vector<128x96xf32>
    %cst = arith.constant dense<0.000000e+00> : vector<16x96xf32>
    %6 = tpu.matmul %4, %5, %cst {dimension_numbers = #tpu.dot_dimension_numbers<[1], [0], [0], [1], [0, 0, 1, 1], [], []>} : vector<16x128xf32>, vector<128x96xf32>, vector<16x96xf32> -> vector<16x96xf32>
    %7 = arith.addf %3, %6 : vector<16x96xf32>
    %c0_6 = arith.constant 0 : index
    %c0_7 = arith.constant 0 : index
    %8 = vector.load %arg18[%c0_6, %c0_7] : memref<16x96xf32, #tpu.memory_space<vmem>>, vector<16x96xf32>
    tpu.vector_store %arg18[%c0_6, %c0_7], %7 {strides = array<i32>} : memref<16x96xf32, #tpu.memory_space<vmem>>, vector<16x96xf32>,
    %c0_i32_8 = arith.constant 0 : i32
    %9 = arith.cmpi eq, %arg1, %c0_i32_8 : i32
    %10 = arith.extui %9 : i1 to i32
    %c0_i32_9 = arith.constant 0 : i32
    %11 = arith.cmpi ne, %10, %c0_i32_9 : i32
    scf.if %11 {
      %c0_10 = arith.constant 0 : index
      %c0_11 = arith.constant 0 : index
      %12 = vector.load %arg18[%c0_10, %c0_11] : memref<16x96xf32, #tpu.memory_space<vmem>>, vector<16x96xf32>
      %c0_12 = arith.constant 0 : index
      %c0_13 = arith.constant 0 : index
      %13 = vector.load %arg4[%c0_12, %c0_13] : memref<16x32xf32, #tpu.memory_space<vmem>>, vector<16x32xf32>
      %c0_14 = arith.constant 0 : index
      %c0_15 = arith.constant 0 : index
      %14 = vector.load %arg5[%c0_14, %c0_15] : memref<96x32xf32, #tpu.memory_space<vmem>>, vector<96x32xf32>
      %cst_16 = arith.constant dense<0.000000e+00> : vector<16x32xf32>
      %15 = tpu.matmul %12, %14, %cst_16 {dimension_numbers = #tpu.dot_dimension_numbers<[1], [0], [0], [1], [0, 0, 1, 1], [], []>} : vector<16x96xf32>, vector<96x32xf32>, vector<16x32xf32> -> vector<16x32xf32>
      %c0_17 = arith.constant 0 : index
      %c0_18 = arith.constant 0 : index
      %16 = vector.load %arg8[%c0_17, %c0_18] : memref<32x32xf32, #tpu.memory_space<vmem>>, vector<32x32xf32>
      %cst_19 = arith.constant dense<0.000000e+00> : vector<16x32xf32>
      %17 = tpu.matmul %13, %16, %cst_19 {dimension_numbers = #tpu.dot_dimension_numbers<[1], [0], [0], [1], [0, 0, 1, 1], [], []>} : vector<16x32xf32>, vector<32x32xf32>, vector<16x32xf32> -> vector<16x32xf32>
      %18 = arith.addf %15, %17 : vector<16x32xf32>
      %c0_20 = arith.constant 0 : index
      %c0_21 = arith.constant 0 : index
      %19 = vector.load %arg11[%c0_20, %c0_21] : memref<1x32xf32, #tpu.memory_space<vmem>>, vector<1x32xf32>
      %20 = vector.broadcast %19 : vector<1x32xf32> to vector<16x32xf32>
      %21 = arith.addf %18, %20 : vector<16x32xf32>
      %22 = arith.negf %21 : vector<16x32xf32>
      %23 = math.exp %22 : vector<16x32xf32>
      %cst_22 = arith.constant 1.000000e+00 : f32
      %24 = vector.broadcast %cst_22 : f32 to vector<16x32xf32>
      %25 = arith.addf %24, %23 : vector<16x32xf32>
      %26 = arith.divf %24, %25 : vector<16x32xf32>
      %c0_23 = arith.constant 0 : index
      %c0_24 = arith.constant 0 : index
      %27 = vector.load %arg6[%c0_23, %c0_24] : memref<96x32xf32, #tpu.memory_space<vmem>>, vector<96x32xf32>
      %cst_25 = arith.constant dense<0.000000e+00> : vector<16x32xf32>
      %28 = tpu.matmul %12, %27, %cst_25 {dimension_numbers = #tpu.dot_dimension_numbers<[1], [0], [0], [1], [0, 0, 1, 1], [], []>} : vector<16x96xf32>, vector<96x32xf32>, vector<16x32xf32> -> vector<16x32xf32>
      %c0_26 = arith.constant 0 : index
      %c0_27 = arith.constant 0 : index
      %29 = vector.load %arg9[%c0_26, %c0_27] : memref<32x32xf32, #tpu.memory_space<vmem>>, vector<32x32xf32>
      %cst_28 = arith.constant dense<0.000000e+00> : vector<16x32xf32>
      %30 = tpu.matmul %13, %29, %cst_28 {dimension_numbers = #tpu.dot_dimension_numbers<[1], [0], [0], [1], [0, 0, 1, 1], [], []>} : vector<16x32xf32>, vector<32x32xf32>, vector<16x32xf32> -> vector<16x32xf32>
      %31 = arith.addf %28, %30 : vector<16x32xf32>
      %c0_29 = arith.constant 0 : index
      %c0_30 = arith.constant 0 : index
      %32 = vector.load %arg12[%c0_29, %c0_30] : memref<1x32xf32, #tpu.memory_space<vmem>>, vector<1x32xf32>
      %33 = vector.broadcast %32 : vector<1x32xf32> to vector<16x32xf32>
      %34 = arith.addf %31, %33 : vector<16x32xf32>
      %35 = arith.negf %34 : vector<16x32xf32>
      %36 = math.exp %35 : vector<16x32xf32>
      %cst_31 = arith.constant 1.000000e+00 : f32
      %37 = vector.broadcast %cst_31 : f32 to vector<16x32xf32>
      %38 = arith.addf %37, %36 : vector<16x32xf32>
      %39 = arith.divf %37, %38 : vector<16x32xf32>
      %c0_32 = arith.constant 0 : index
      %c0_33 = arith.constant 0 : index
      %40 = vector.load %arg7[%c0_32, %c0_33] : memref<96x32xf32, #tpu.memory_space<vmem>>, vector<96x32xf32>
      %cst_34 = arith.constant dense<0.000000e+00> : vector<16x32xf32>
      %41 = tpu.matmul %12, %40, %cst_34 {dimension_numbers = #tpu.dot_dimension_numbers<[1], [0], [0], [1], [0, 0, 1, 1], [], []>} : vector<16x96xf32>, vector<96x32xf32>, vector<16x32xf32> -> vector<16x32xf32>
      %42 = arith.mulf %13, %39 : vector<16x32xf32>
      %c0_35 = arith.constant 0 : index
      %c0_36 = arith.constant 0 : index
      %43 = vector.load %arg10[%c0_35, %c0_36] : memref<32x32xf32, #tpu.memory_space<vmem>>, vector<32x32xf32>
      %cst_37 = arith.constant dense<0.000000e+00> : vector<16x32xf32>
      %44 = tpu.matmul %42, %43, %cst_37 {dimension_numbers = #tpu.dot_dimension_numbers<[1], [0], [0], [1], [0, 0, 1, 1], [], []>} : vector<16x32xf32>, vector<32x32xf32>, vector<16x32xf32> -> vector<16x32xf32>
      %45 = arith.addf %41, %44 : vector<16x32xf32>
      %c0_38 = arith.constant 0 : index
      %c0_39 = arith.constant 0 : index
      %46 = vector.load %arg13[%c0_38, %c0_39] : memref<1x32xf32, #tpu.memory_space<vmem>>, vector<1x32xf32>
      %47 = vector.broadcast %46 : vector<1x32xf32> to vector<16x32xf32>
      %48 = arith.addf %45, %47 : vector<16x32xf32>
      %49 = math.tanh %48 : vector<16x32xf32>
      %50 = arith.mulf %26, %13 : vector<16x32xf32>
      %cst_40 = arith.constant 1.000000e+00 : f32
      %51 = vector.broadcast %cst_40 : f32 to vector<16x32xf32>
      %52 = arith.subf %51, %26 : vector<16x32xf32>
      %53 = arith.mulf %52, %49 : vector<16x32xf32>
      %54 = arith.addf %50, %53 : vector<16x32xf32>
      %cst_41 = arith.constant 0.000000e+00 : f32
      %55 = vector.broadcast %cst_41 : f32 to vector<16x32xf32>
      %56 = arith.maximumf %54, %55 : vector<16x32xf32>
      %c0_42 = arith.constant 0 : index
      %c0_43 = arith.constant 0 : index
      %57 = vector.load %arg14[%c0_42, %c0_43] : memref<32x128xf32, #tpu.memory_space<vmem>>, vector<32x128xf32>
      %cst_44 = arith.constant dense<0.000000e+00> : vector<16x128xf32>
      %58 = tpu.matmul %56, %57, %cst_44 {dimension_numbers = #tpu.dot_dimension_numbers<[1], [0], [0], [1], [0, 0, 1, 1], [], []>} : vector<16x32xf32>, vector<32x128xf32>, vector<16x128xf32> -> vector<16x128xf32>
      %c0_45 = arith.constant 0 : index
      %c0_46 = arith.constant 0 : index
      %59 = vector.load %arg15[%c0_45, %c0_46] : memref<32x128xf32, #tpu.memory_space<vmem>>, vector<32x128xf32>
      %cst_47 = arith.constant dense<0.000000e+00> : vector<16x128xf32>
      %60 = tpu.matmul %54, %59, %cst_47 {dimension_numbers = #tpu.dot_dimension_numbers<[1], [0], [0], [1], [0, 0, 1, 1], [], []>} : vector<16x32xf32>, vector<32x128xf32>, vector<16x128xf32> -> vector<16x128xf32>
      %61 = arith.addf %58, %60 : vector<16x128xf32>
      %c0_48 = arith.constant 0 : index
      %c0_49 = arith.constant 0 : index
      %62 = vector.load %arg16[%c0_48, %c0_49] : memref<1x128xf32, #tpu.memory_space<vmem>>, vector<1x128xf32>
      %63 = vector.broadcast %62 : vector<1x128xf32> to vector<16x128xf32>
      %64 = arith.addf %61, %63 : vector<16x128xf32>
      %c0_50 = arith.constant 0 : index
      %c0_51 = arith.constant 0 : index
      %65 = vector.load %arg17[%c0_50, %c0_51] : memref<16x128xf32, #tpu.memory_space<vmem>>, vector<16x128xf32>
      tpu.vector_store %arg17[%c0_50, %c0_51], %64 {strides = array<i32>} : memref<16x128xf32, #tpu.memory_space<vmem>>, vector<16x128xf32>,
    } else {
    }
    return
  }
  func.func @transform_0(%arg0: i32, %arg1: i32) -> (i32, i32) {
    %c0_i32 = arith.constant 0 : i32
    return %arg0, %arg1 : i32, i32
  }
  func.func @transform_1(%arg0: i32, %arg1: i32) -> (i32, i32) {
    %c0_i32 = arith.constant 0 : i32
    %c0_i32_0 = arith.constant 0 : i32
    return %arg1, %c0_i32 : i32, i32
  }
  func.func @transform_2(%arg0: i32, %arg1: i32) -> (i32, i32) {
    %c0_i32 = arith.constant 0 : i32
    %c0_i32_0 = arith.constant 0 : i32
    return %arg0, %c0_i32 : i32, i32
  }
  func.func @transform_3(%arg0: i32, %arg1: i32) -> (i32, i32) {
    %c0_i32 = arith.constant 0 : i32
    %c0_i32_0 = arith.constant 0 : i32
    %c0_i32_1 = arith.constant 0 : i32
    return %c0_i32, %c0_i32_0 : i32, i32
  }
  func.func @transform_4(%arg0: i32, %arg1: i32) -> (i32, i32) {
    %c0_i32 = arith.constant 0 : i32
    %c0_i32_0 = arith.constant 0 : i32
    %c0_i32_1 = arith.constant 0 : i32
    return %c0_i32, %c0_i32_0 : i32, i32
  }
  func.func @transform_5(%arg0: i32, %arg1: i32) -> (i32, i32) {
    %c0_i32 = arith.constant 0 : i32
    %c0_i32_0 = arith.constant 0 : i32
    %c0_i32_1 = arith.constant 0 : i32
    return %c0_i32, %c0_i32_0 : i32, i32
  }
  func.func @transform_6(%arg0: i32, %arg1: i32) -> (i32, i32) {
    %c0_i32 = arith.constant 0 : i32
    %c0_i32_0 = arith.constant 0 : i32
    %c0_i32_1 = arith.constant 0 : i32
    return %c0_i32, %c0_i32_0 : i32, i32
  }
  func.func @transform_7(%arg0: i32, %arg1: i32) -> (i32, i32) {
    %c0_i32 = arith.constant 0 : i32
    %c0_i32_0 = arith.constant 0 : i32
    %c0_i32_1 = arith.constant 0 : i32
    return %c0_i32, %c0_i32_0 : i32, i32
  }
  func.func @transform_8(%arg0: i32, %arg1: i32) -> (i32, i32) {
    %c0_i32 = arith.constant 0 : i32
    %c0_i32_0 = arith.constant 0 : i32
    %c0_i32_1 = arith.constant 0 : i32
    return %c0_i32, %c0_i32_0 : i32, i32
  }
  func.func @transform_9(%arg0: i32, %arg1: i32) -> (i32, i32) {
    %c0_i32 = arith.constant 0 : i32
    %c0_i32_0 = arith.constant 0 : i32
    %c0_i32_1 = arith.constant 0 : i32
    return %c0_i32, %c0_i32_0 : i32, i32
  }
  func.func @transform_10(%arg0: i32, %arg1: i32) -> (i32, i32) {
    %c0_i32 = arith.constant 0 : i32
    %c0_i32_0 = arith.constant 0 : i32
    %c0_i32_1 = arith.constant 0 : i32
    return %c0_i32, %c0_i32_0 : i32, i32
  }
  func.func @transform_11(%arg0: i32, %arg1: i32) -> (i32, i32) {
    %c0_i32 = arith.constant 0 : i32
    %c0_i32_0 = arith.constant 0 : i32
    %c0_i32_1 = arith.constant 0 : i32
    return %c0_i32, %c0_i32_0 : i32, i32
  }
  func.func @transform_12(%arg0: i32, %arg1: i32) -> (i32, i32) {
    %c0_i32 = arith.constant 0 : i32
    %c0_i32_0 = arith.constant 0 : i32
    %c0_i32_1 = arith.constant 0 : i32
    return %c0_i32, %c0_i32_0 : i32, i32
  }
  func.func @transform_13(%arg0: i32, %arg1: i32) -> (i32, i32) {
    %c0_i32 = arith.constant 0 : i32
    %c0_i32_0 = arith.constant 0 : i32
    %c0_i32_1 = arith.constant 0 : i32
    return %c0_i32, %c0_i32_0 : i32, i32
  }
  func.func @transform_14(%arg0: i32, %arg1: i32) -> (i32, i32) {
    %c0_i32 = arith.constant 0 : i32
    %c0_i32_0 = arith.constant 0 : i32
    %c0_i32_1 = arith.constant 0 : i32
    return %c0_i32, %c0_i32_0 : i32, i32
  }
  func.func @transform_15(%arg0: i32, %arg1: i32) -> (i32, i32) {
    %c0_i32 = arith.constant 0 : i32
    %c0_i32_0 = arith.constant 0 : i32
    return %arg0, %c0_i32 : i32, i32
  }
}

</mosaic_0001>

<bundles_post_ra>
// kernel: tpu_custom_call.1
= control target key start
LH: loop header
LB: loop body
LE: loop exit
PB: predicated region body
PF: predicated region fallthrough
CT: control target
= control target key end

     0   :  { %vm55_vm0 = vcmask 785408   ;;  %v1429_v5 = vmov 0.0   ;;  %vm181_vm1 = vcmask 261120   ;;  %s1808_s0 = inlined_call_operand.vmem [shape: f32[16,128], index: 0, kind: input, shape index: {}]   ;;  %s1809_s1 = inlined_call_operand.vmem [shape: f32[128,96], index: 1, kind: input, shape index: {}]   ;;  %s1810_s2 = inlined_call_operand.vmem [shape: f32[16,32], index: 2, kind: input, shape index: {}]   ;;  %s1811_s3 = inlined_call_operand.vmem [shape: f32[96,32], index: 3, kind: input, shape index: {}]   ;;  %s1812_s4 = inlined_call_operand.vmem [shape: f32[96,32], index: 4, kind: input, shape index: {}]   ;;  %s1813_s5 = inlined_call_operand.vmem [shape: f32[96,32], index: 5, kind: input, shape index: {}]   ;;  %s1814_s6 = inlined_call_operand.vmem [shape: f32[32,32], index: 6, kind: input, shape index: {}]   ;;  %s1815_s7 = inlined_call_operand.vmem [shape: f32[32,32], index: 7, kind: input, shape index: {}]   ;;  %s1816_s8 = inlined_call_operand.vmem [shape: f32[32,32], index: 8, kind: input, shape index: {}]   ;;  %s1817_s9 = inlined_call_operand.vmem [shape: f32[1,32], index: 9, kind: input, shape index: {}]   ;;  %s1818_s10 = inlined_call_operand.vmem [shape: f32[1,32], index: 10, kind: input, shape index: {}]   ;;  %s1819_s11 = inlined_call_operand.vmem [shape: f32[1,32], index: 11, kind: input, shape index: {}]   ;;  %s1820_s12 = inlined_call_operand.vmem [shape: f32[32,128], index: 12, kind: input, shape index: {}]   ;;  %s1821_s13 = inlined_call_operand.vmem [shape: f32[32,128], index: 13, kind: input, shape index: {}]   ;;  %s1822_s14 = inlined_call_operand.vmem [shape: f32[1,128], index: 14, kind: input, shape index: {}]   ;;  %s1823_s15 = inlined_call_operand.hbm [shape: f32[16,128], index: 15, kind: output, shape index: {}]  }
   0x1   :  { %v62_v0 = vld [vmem:[%s1809_s1] sm:$0xff]  ;;  %v63_v1 = vld [vmem:[%s1809_s1 + $0x8] sm:$0xff]  ;;  %v64_v2 = vld [vmem:[%s1809_s1 + $0x10] sm:$0xff]  ;;  %57 = vst.msk [vmem:[#allocation2 + $0x8] sm:$0xff] %vm55_vm0, %v1429_v5 }
   0x2   :  { %v1229_v3 = vpack.c.bf16 %v63_v1, %v62_v0  ;;  %v65_v4 = vld [vmem:[%s1809_s1 + $0x18] sm:$0xff]  ;;  %56 = vst.msk [vmem:[#allocation2] sm:$0xff] %vm55_vm0, %v1429_v5  ;;  %v66_v7 = vld [vmem:[%s1809_s1 + $0x20] sm:$0xff]  ;;  %v67_v8 = vld [vmem:[%s1809_s1 + $0x28] sm:$0xff] }
   0x3   :  { %v1233_v6 = vpack.c.bf16 %v65_v4, %v64_v2  ;;  %v1237_v9 = vpack.c.bf16 %v67_v8, %v66_v7  ;;  %v68_v10 = vld [vmem:[%s1809_s1 + $0x30] sm:$0xff]  ;;  %v69_v11 = vld [vmem:[%s1809_s1 + $0x38] sm:$0xff]  ;;  %v60_v12 = vld [vmem:[%s1808_s0] sm:$0xff] }
   0x4   :  { %1230 = vmatprep.subr.bf16.mxu0 %v1229_v3  ;;  %1090 = vmatprep.mubr.f32.mxu0 %v60_v12  ;;  %v177_v13 = vld [vmem:[%s1814_s6] sm:$0xff]  ;;  %v178_v14 = vld [vmem:[%s1814_s6 + $0x8] sm:$0xff]  ;;  %v179_v15 = vld [vmem:[%s1814_s6 + $0x10] sm:$0xff]  ;;  %v1241_v22 = vpack.c.bf16 %v69_v11, %v68_v10 }
   0x5   :  { %1232 = vmatpush3.bf16.msra.mxu0 %v1229_v3  ;;  %v1261_v16 = vpack.c.bf16 %v178_v14, %v177_v13  ;;  %v180_v17 = vld [vmem:[%s1814_s6 + $0x18] sm:$0xff]  ;;  %v1557_v18 = vld [vmem:[%s1810_s2] sm:$0xff]  ;;  %v166_v21 = vld [vmem:[%s1811_s3 + $0x8] sm:$0xff] }
   0x6   :  { %1234 = vmatprep.subr.bf16.mxu0 %v1233_v6  ;;  %v1265_v19 = vpack.c.bf16 %v180_v17, %v179_v15  ;;  %1101 = vmatprep.mubr.msk.f32.mxu1 %vm181_vm1, %v1557_v18  ;;  %v165_v20 = vld [vmem:[%s1811_s3] sm:$0xff]  ;;  %v71_v24 = vld [vmem:[%s1809_s1 + $0x48] sm:$0xff]  ;;  %v167_v26 = vld [vmem:[%s1811_s3 + $0x10] sm:$0xff] }
   0x7   :  { %1262 = vmatprep.subr.bf16.mxu1 %v1261_v16  ;;  %v70_v23 = vld [vmem:[%s1809_s1 + $0x40] sm:$0xff]  ;;  %v1269_v25 = vpack.c.bf16 %v166_v21, %v165_v20  ;;  %v168_v27 = vld [vmem:[%s1811_s3 + $0x18] sm:$0xff] }
   0x8   :  { %1264 = vmatpush3.bf16.msra.mxu1 %v1261_v16 }
   0x9   :  { %1236 = vmatpush3.bf16.msra.mxu0 %v1233_v6  ;;  %1266 = vmatprep.subr.bf16.mxu1 %v1265_v19 }
   0xa   :  { %1238 = vmatprep.subr.bf16.mxu0 %v1237_v9 }
   0xd   :  { %1240 = vmatpush3.bf16.msra.mxu0 %v1237_v9 }
   0xe   :  { %20 = vsyncpa [#allocation4], 0  ;;  %1242 = vmatprep.subr.bf16.mxu0 %v1241_v22  ;;  %v1245_v28 = vpack.c.bf16 %v71_v24, %v70_v23  ;;  %v72_v29 = vld [vmem:[%s1809_s1 + $0x50] sm:$0xff]  ;;  %v73_v30 = vld [vmem:[%s1809_s1 + $0x58] sm:$0xff]  ;;  %1268 = vmatpush3.bf16.msra.mxu1 %v1265_v19  ;;  %v1273_v32 = vpack.c.bf16 %v168_v27, %v167_v26 }
   0xf   :  { %v1588_v31 = vld [vmem:[%s1810_s2 + $0x8] sm:$0xff]  ;;  %1270 = vmatprep.subr.bf16.mxu1 %v1269_v25  ;;  %v169_v33 = vld [vmem:[%s1811_s3 + $0x20] sm:$0xff]  ;;  %v1249_v35 = vpack.c.bf16 %v73_v30, %v72_v29  ;;  %v76_v40 = vld [vmem:[%s1809_s1 + $0x70] sm:$0xff] }
  0x10   :  { %v170_v34 = vld [vmem:[%s1811_s3 + $0x28] sm:$0xff]  ;;  %v74_v36 = vld [vmem:[%s1809_s1 + $0x60] sm:$0xff]  ;;  %v77_v41 = vld [vmem:[%s1809_s1 + $0x78] sm:$0xff] }
  0x11   :  { %1244 = vmatpush3.bf16.msra.mxu0 %v1241_v22  ;;  %1102 = vmatmul.mubr.msk.f32.vlgmr.msra.gmra.mrb[0].mxu1 %vm181_vm1, %v1588_v31  ;;  %v75_v37 = vld [vmem:[%s1809_s1 + $0x68] sm:$0xff]  ;;  %v1277_v38 = vpack.c.bf16 %v170_v34, %v169_v33  ;;  %v1257_v42 = vpack.c.bf16 %v77_v41, %v76_v40  ;;  %v365_v43 = vld [vmem:[%s1812_s4] sm:$0xff]  ;;  %v367_v46 = vld [vmem:[%s1812_s4 + $0x10] sm:$0xff] }
  0x12   :  { %1246 = vmatprep.subr.bf16.mxu0 %v1245_v28  ;;  %1272 = vmatpush3.bf16.msra.mxu1 %v1269_v25  ;;  %v1253_v39 = vpack.c.bf16 %v75_v37, %v74_v36  ;;  %v366_v44 = vld [vmem:[%s1812_s4 + $0x8] sm:$0xff]  ;;  %v368_v47 = vld [vmem:[%s1812_s4 + $0x18] sm:$0xff]  ;;  %v369_v50 = vld [vmem:[%s1812_s4 + $0x20] sm:$0xff] }
  0x13   :  { %1274 = vmatprep.subr.bf16.mxu1 %v1273_v32  ;;  %v1301_v45 = vpack.c.bf16 %v366_v44, %v365_v43  ;;  %v61_v48 = vld [vmem:[%s1808_s0 + $0x8] sm:$0xff]  ;;  %v1305_v49 = vpack.c.bf16 %v368_v47, %v367_v46  ;;  %v171_v53 = vld [vmem:[%s1811_s3 + $0x30] sm:$0xff]  ;;  %v172_v54 = vld [vmem:[%s1811_s3 + $0x38] sm:$0xff] }
  0x14   :  { %v370_v51 = vld [vmem:[%s1812_s4 + $0x28] sm:$0xff]  ;;  %v1281_v55 = vpack.c.bf16 %v172_v54, %v171_v53  ;;  %v371_v56 = vld [vmem:[%s1812_s4 + $0x30] sm:$0xff]  ;;  %v372_v57 = vld [vmem:[%s1812_s4 + $0x38] sm:$0xff] }
  0x15   :  { %1248 = vmatpush3.bf16.msra.mxu0 %v1245_v28  ;;  %v1309_v52 = vpack.c.bf16 %v370_v51, %v369_v50  ;;  %v1313_v58 = vpack.c.bf16 %v372_v57, %v371_v56  ;;  %v173_v59 = vld [vmem:[%s1811_s3 + $0x40] sm:$0xff]  ;;  %v174_v60 = vld [vmem:[%s1811_s3 + $0x48] sm:$0xff]  ;;  %v175_v1 = vld [vmem:[%s1811_s3 + $0x50] sm:$0xff] }
  0x16   :  { %1250 = vmatprep.subr.bf16.mxu0 %v1249_v35  ;;  %1276 = vmatpush3.bf16.msra.mxu1 %v1273_v32  ;;  %v1285_v61 = vpack.c.bf16 %v174_v60, %v173_v59  ;;  %v373_v62 = vld [vmem:[%s1812_s4 + $0x40] sm:$0xff]  ;;  %v374_v63 = vld [vmem:[%s1812_s4 + $0x48] sm:$0xff]  ;;  %v176_v2 = vld [vmem:[%s1811_s3 + $0x58] sm:$0xff] }
  0x17   :  { %1278 = vmatprep.subr.bf16.mxu1 %v1277_v38  ;;  %v1317_v0 = vpack.c.bf16 %v374_v63, %v373_v62  ;;  %v375_v3 = vld [vmem:[%s1812_s4 + $0x50] sm:$0xff]  ;;  %v1289_v4 = vpack.c.bf16 %v176_v2, %v175_v1  ;;  %v376_v5 = vld [vmem:[%s1812_s4 + $0x58] sm:$0xff]  ;;  %v377_v7 = vld [vmem:[%s1815_s7] sm:$0xff] }
  0x18   :  { %v1321_v6 = vpack.c.bf16 %v376_v5, %v375_v3  ;;  %v378_v8 = vld [vmem:[%s1815_s7 + $0x8] sm:$0xff]  ;;  %v58_v11 = vld [vmem:[#allocation2] sm:$0xff]  ;;  %v379_v16 = vld [vmem:[%s1815_s7 + $0x10] sm:$0xff] }
  0x19   :  { %1252 = vmatpush3.bf16.msra.mxu0 %v1249_v35  ;;  %v1293_v9 = vpack.c.bf16 %v378_v8, %v377_v7  ;;  %v59_v10 = vld [vmem:[#allocation2 + $0x8] sm:$0xff]  ;;  %v380_v17 = vld [vmem:[%s1815_s7 + $0x18] sm:$0xff]  ;;  %v566_v22 = vld [vmem:[%s1816_s8] sm:$0xff] }
  0x1a   :  { %1254 = vmatprep.subr.bf16.mxu0 %v1253_v39  ;;  %1280 = vmatpush3.bf16.msra.mxu1 %v1277_v38  ;;  %v1297_v20 = vpack.c.bf16 %v380_v17, %v379_v16  ;;  %v567_v23 = vld [vmem:[%s1816_s8 + $0x8] sm:$0xff]  ;;  %v568_v24 = vld [vmem:[%s1816_s8 + $0x10] sm:$0xff]  ;;  %v569_v26 = vld [vmem:[%s1816_s8 + $0x18] sm:$0xff] }
  0x1b   :  { %1282 = vmatprep.subr.bf16.mxu1 %v1281_v55  ;;  %v1325_v25 = vpack.c.bf16 %v567_v23, %v566_v22  ;;  %v1329_v27 = vpack.c.bf16 %v569_v26, %v568_v24  ;;  %v552_v28 = vld [vmem:[%s1813_s5] sm:$0xff]  ;;  %v553_v29 = vld [vmem:[%s1813_s5 + $0x8] sm:$0xff]  ;;  %v554_v50 = vld [vmem:[%s1813_s5 + $0x10] sm:$0xff] }
  0x1c   :  { %v1333_v30 = vpack.c.bf16 %v553_v29, %v552_v28  ;;  %v955_v37 = vld [vmem:[%s1818_s10] ss:$0 sm:$0xff]  ;;  %v555_v51 = vld [vmem:[%s1813_s5 + $0x18] sm:$0xff]  ;;  %v557_v57 = vld [vmem:[%s1813_s5 + $0x28] sm:$0xff] }
  0x1d   :  { %1256 = vmatpush3.bf16.msra.mxu0 %v1253_v39  ;;  %v556_v56 = vld [vmem:[%s1813_s5 + $0x20] sm:$0xff]  ;;  %v558_v59 = vld [vmem:[%s1813_s5 + $0x30] sm:$0xff]  ;;  %v559_v60 = vld [vmem:[%s1813_s5 + $0x38] sm:$0xff] }
  0x1e   :  { %1258 = vmatprep.subr.bf16.mxu0 %v1257_v42  ;;  %1284 = vmatpush3.bf16.msra.mxu1 %v1281_v55  ;;  %v1337_v55 = vpack.c.bf16 %v555_v51, %v554_v50  ;;  %v560_v62 = vld [vmem:[%s1813_s5 + $0x40] sm:$0xff]  ;;  %v561_v63 = vld [vmem:[%s1813_s5 + $0x48] sm:$0xff]  ;;  %v562_v1 = vld [vmem:[%s1813_s5 + $0x50] sm:$0xff] }
  0x1f   :  { %1286 = vmatprep.subr.bf16.mxu1 %v1285_v61  ;;  %v563_v2 = vld [vmem:[%s1813_s5 + $0x58] sm:$0xff]  ;;  %v752_v5 = vld [vmem:[%s1821_s13 + $0x8] sm:$0xff]  ;;  %v753_v7 = vld [vmem:[%s1821_s13 + $0x10] sm:$0xff] }
  0x20   :  { %v1353_v3 = vpack.c.bf16 %v563_v2, %v562_v1  ;;  %v754_v8 = vld [vmem:[%s1821_s13 + $0x18] sm:$0xff]  ;;  %v962_v23 = vld [vmem:[%s1819_s11] ss:$0 sm:$0xff] }
  0x21   :  { %1260 = vmatpush3.bf16.msra.mxu0 %v1257_v42 }
  0x22   :  { %1302 = vmatprep.subr.bf16.mxu0 %v1301_v45  ;;  %1288 = vmatpush3.bf16.msra.mxu1 %v1285_v61  ;;  %v1345_v61 = vpack.c.bf16 %v559_v60, %v558_v59 }
  0x23   :  { %1290 = vmatprep.subr.bf16.mxu1 %v1289_v4 }
  0x24   :  { %1091 = vmatmul.mubr.f32.vlgmr.msra.gmra.mrb[0].mxu0 %v61_v48 }
  0x25   :  { %1304 = vmatpush3.bf16.msra.mxu0 %v1301_v45 }
  0x26   :  { %1306 = vmatprep.subr.bf16.mxu0 %v1305_v49  ;;  %1292 = vmatpush3.bf16.msra.mxu1 %v1289_v4  ;;  %v751_v4 = vld [vmem:[%s1821_s13] sm:$0xff] }
  0x27   :  { %1294 = vmatprep.subr.bf16.mxu1 %v1293_v9 }
  0x29   :  { %1308 = vmatpush3.bf16.msra.mxu0 %v1305_v49 }
  0x2a   :  { %1310 = vmatprep.subr.bf16.mxu0 %v1309_v52 }
  0x2d   :  { %1312 = vmatpush3.bf16.msra.mxu0 %v1309_v52 }
  0x2e   :  { %1314 = vmatprep.subr.bf16.mxu0 %v1313_v58 }
  0x31   :  { %1316 = vmatpush3.bf16.msra.mxu0 %v1313_v58  ;;  %v1341_v58 = vpack.c.bf16 %v557_v57, %v556_v56 }
  0x32   :  { %1318 = vmatprep.subr.bf16.mxu0 %v1317_v0 }
  0x35   :  { %1320 = vmatpush3.bf16.msra.mxu0 %v1317_v0  ;;  %v1349_v0 = vpack.c.bf16 %v561_v63, %v560_v62 }
  0x36   :  { %1322 = vmatprep.subr.bf16.mxu0 %v1321_v6 }
  0x39   :  { %1324 = vmatpush3.bf16.msra.mxu0 %v1321_v6  ;;  %v1357_v6 = vpack.c.bf16 %v752_v5, %v751_v4 }
  0x3b   :  { %1358 = vmatprep.subr.bf16.mxu0 %v1357_v6 }
  0xf7   :  { %v1092_v12 = vpop.f32.mrb[0].mxu0 }
  0xf8   :  { %v154_v13 = vadd.f32 %v1092_v12, %v59_v10  ;;  %v144_v14 = vpop.f32.mrb[1].mxu0  ;;  %v747_v10 = vld [vmem:[%s1820_s12] sm:$0xff] }
  0xf9   :  { %v153_v15 = vadd.f32 %v144_v14, %v58_v11  ;;  %v748_v11 = vld [vmem:[%s1820_s12 + $0x8] sm:$0xff] }
  0xfa   :  { %157 = vst.msk [vmem:[#allocation2 + $0x8] sm:$0xff] %vm55_vm0, %v154_v13  ;;  %v1365_v12 = vpack.c.bf16 %v748_v11, %v747_v10  ;;  %v948_v13 = vld [vmem:[%s1817_s9] ss:$0 sm:$0xff] }
  0xfb   :  { %156 = vst.msk [vmem:[#allocation2] sm:$0xff] %vm55_vm0, %v153_v15 }
 0x101   :  { %v1683_v21 = vld [vmem:[#allocation2 + $0x8] sm:$0xff] }
 0x102   :  { %v161_v19 = vld [vmem:[#allocation2] sm:$0xff] }
 0x103   :  { %1128 = vmatprep.mubr.msk.f32.mxu1 %vm55_vm0, %v161_v19  ;;  %1166 = vmatprep.mubr.msk.f32.mxu0 %vm55_vm0, %v161_v19 }
 0x104   :  { %1129 = vmatmul.mubr.msk.f32.vlgmr.msra.gmra.mrb[0].mxu1 %vm55_vm0, %v1683_v21  ;;  %1167 = vmatmul.mubr.msk.f32.vlgmr.msra.gmra.mrb[2].mxu0 %vm55_vm0, %v1683_v21 }
 0x105   :  { %1296 = vmatpush3.bf16.msra.mxu1 %v1293_v9  ;;  %1139 = vmatprep.mubr.msk.f32.mxu1 %vm181_vm1, %v1557_v18  ;;  %v1361_v9 = vpack.c.bf16 %v754_v8, %v753_v7 }
 0x106   :  { %1298 = vmatprep.subr.bf16.mxu1 %v1297_v20  ;;  %1360 = vmatpush3.bf16.msra.mxu0 %v1357_v6 }
 0x107   :  { %1362 = vmatprep.subr.bf16.mxu0 %v1361_v9 }
 0x109   :  { %1300 = vmatpush3.bf16.msra.mxu1 %v1297_v20 }
 0x10a   :  { %1326 = vmatprep.subr.bf16.mxu1 %v1325_v25  ;;  %1364 = vmatpush3.bf16.msra.mxu0 %v1361_v9 }
 0x10b   :  { %1366 = vmatprep.subr.bf16.mxu0 %v1365_v12 }
 0x10c   :  { %1140 = vmatmul.mubr.msk.f32.vlgmr.msra.gmra.mrb[2].mxu1 %vm181_vm1, %v1588_v31 }
 0x10d   :  { %1328 = vmatpush3.bf16.msra.mxu1 %v1325_v25 }
 0x10e   :  { %1330 = vmatprep.subr.bf16.mxu1 %v1329_v27 }
 0x111   :  { %1332 = vmatpush3.bf16.msra.mxu1 %v1329_v27 }
 0x112   :  { %1334 = vmatprep.subr.bf16.mxu1 %v1333_v30 }
 0x1d7   :  { %v1711_v32 = vpop.f32.mrb[0].mxu1  ;;  %v1168_v33 = vpop.f32.mrb[2].mxu0 }
 0x1d8   :  { %v1713_v34 = vpop.f32.mrb[1].mxu1  ;;  %v522_v35 = vpop.f32.mrb[3].mxu0  ;;  %v352_v14 = vadd.f32 %v1711_v32, %v948_v13 }
 0x1d9   :  { %v351_v15 = vadd.f32 %v948_v13, %v1713_v34 }
 0x1da   :  { %v950_v16 = vmul.f32 -1.442695, %v352_v14 }
 0x1db   :  { %v949_v17 = vmul.f32 -1.442695, %v351_v15 }
 0x1df   :  { %v1141_v36 = vpop.f32.mrb[2].mxu1 }
 0x1e0   :  { %v528_v38 = vadd.f32 %v1168_v33, %v1141_v36  ;;  %v447_v39 = vpop.f32.mrb[3].mxu1 }
 0x1e1   :  { %v523_v40 = vadd.f32 %v522_v35, %v447_v39  ;;  %v749_v39 = vld [vmem:[%s1820_s12 + $0x10] sm:$0xff] }
 0x1e2   :  { %v539_v41 = vadd.f32 %v955_v37, %v528_v38 }
 0x1e3   :  { %v538_v42 = vadd.f32 %v955_v37, %v523_v40  ;;  %v750_v40 = vld [vmem:[%s1820_s12 + $0x18] sm:$0xff]  ;;  %s1430_s12 = smov [#allocation3]  }
 0x1e4   :  { %v957_v43 = vmul.f32 -1.442695, %v539_v41  ;;  %s933_s20 = sshll.u32 %s1430_s12, 4  ;;  %s934_s20 = int_to_ptr.vmem [resolvable:$true] %s933_s20 }
 0x1e5   :  { %v956_v44 = vmul.f32 -1.442695, %v538_v42  ;;  %s1405_s21 = scalar_lea.vmem %s934_s20, 256  ;;  %p1410_p1 = scmp.lt.s32.totalorder %s934_s20, %s934_s20 }
 0x1e6   :  { %1385 = vpow2.f32 %v957_v43  ;;  %v1369_v43 = vpack.c.bf16 %v750_v40, %v749_v39  ;;  %p1406_p0 = scmp.ne.s32.totalorder %s934_s20, %s1405_s21  ;;  %p1411_p2 = scmp.lt.s32.totalorder %s1405_s21, %s1405_s21 }
 0x1e7   :  { %1387 = vpow2.f32 %v956_v44 }
 0x1e8   :  { %p1412_p3 = por %p1411_p2, %p1410_p1 }
 0x1ea   :  { %p1413_p4 = pnand %p1412_p3, %p1406_p0 }
 0x1f0   :  { %v1386_v45 = vpop.eup %1385 }
 0x1f1   :  { %v1388_v46 = vpop.eup %1387  ;;  %v547_v47 = vadd.f32 1.0, %v1386_v45 }
 0x1f2   :  { %v546_v48 = vadd.f32 1.0, %v1388_v46 }
 0x1f3   :  { %1389 = vrcp.f32 %v547_v47 }
 0x1f4   :  { %1391 = vrcp.f32 %v546_v48 }
 0x1f5   :  { %1393 = vpow2.f32 %v950_v16 }
 0x1f6   :  { %1395 = vpow2.f32 %v949_v17 }
 0x1fd   :  { %v1390_v49 = vpop.eup %1389 }
 0x1fe   :  { %v1392_v52 = vpop.eup %1391  ;;  %v565_v54 = vmul.f32 %v1390_v49, %v1588_v31 }
 0x1ff   :  { %v564_v53 = vmul.f32 %v1392_v52, %v1557_v18 }
 0x201   :  { %1177 = vmatprep.mubr.msk.f32.mxu1 %vm181_vm1, %v564_v53 }
 0x202   :  { %1178 = vmatmul.mubr.msk.f32.vlgmr.msra.gmra.mrb[4].mxu1 %vm181_vm1, %v565_v54 }
 0x203   :  { %1336 = vmatpush3.bf16.msra.mxu1 %v1333_v30  ;;  %1204 = vmatprep.mubr.msk.f32.mxu1 %vm55_vm0, %v161_v19  ;;  %v1394_v19 = vpop.eup %1393 }
 0x204   :  { %1338 = vmatprep.subr.bf16.mxu1 %v1337_v55  ;;  %v1396_v20 = vpop.eup %1395 }
 0x205   :  { %v359_v22 = vadd.f32 1.0, %v1396_v20 }
 0x207   :  { %1340 = vmatpush3.bf16.msra.mxu1 %v1337_v55 }
 0x208   :  { %1342 = vmatprep.subr.bf16.mxu1 %v1341_v58 }
 0x20b   :  { %1344 = vmatpush3.bf16.msra.mxu1 %v1341_v58 }
 0x20c   :  { %1346 = vmatprep.subr.bf16.mxu1 %v1345_v61 }
 0x20f   :  { %1348 = vmatpush3.bf16.msra.mxu1 %v1345_v61 }
 0x210   :  { %1350 = vmatprep.subr.bf16.mxu1 %v1349_v0 }
 0x213   :  { %1352 = vmatpush3.bf16.msra.mxu1 %v1349_v0 }
 0x214   :  { %1354 = vmatprep.subr.bf16.mxu1 %v1353_v3 }
 0x217   :  { %1356 = vmatpush3.bf16.msra.mxu1 %v1353_v3 }
 0x21a   :  { %1205 = vmatmul.mubr.msk.f32.vlgmr.msra.gmra.mrb[4].mxu1 %vm55_vm0, %v1683_v21  ;;  %v360_v21 = vadd.f32 1.0, %v1394_v19 }
 0x21c   :  { %1397 = vrcp.f32 %v360_v21 }
 0x21d   :  { %1399 = vrcp.f32 %v359_v22 }
 0x226   :  { %v1398_v28 = vpop.eup %1397 }
 0x227   :  { %v1400_v29 = vpop.eup %1399  ;;  %v740_v30 = vsub.f32 1.0, %v1398_v28  ;;  %v738_v36 = vmul.f32 %v1398_v28, %v1588_v31  ;;  %v967_v31 = vld [vmem:[%s1822_s14] ss:$0 sm:$0xff] }
 0x228   :  { %v739_v33 = vsub.f32 1.0, %v1400_v29  ;;  %v737_v37 = vmul.f32 %v1400_v29, %v1557_v18 }
 0x2ed   :  { %v1206_v24 = vpop.f32.mrb[4].mxu1 }
 0x2ee   :  { %v734_v25 = vadd.f32 %v1206_v24, %v962_v23  ;;  %v717_v26 = vpop.f32.mrb[5].mxu1 }
 0x2ef   :  { %v733_v27 = vadd.f32 %v962_v23, %v717_v26 }
 0x2f0   :  { %1401 = vtanh.f32 %v734_v25 }
 0x2f1   :  { %1403 = vtanh.f32 %v733_v27 }
 0x2fa   :  { %v1402_v32 = vpop.eup %1401 }
 0x2fb   :  { %v1404_v34 = vpop.eup %1403  ;;  %v742_v35 = vmul.f32 %v1402_v32, %v740_v30 }
 0x2fc   :  { %v741_v38 = vmul.f32 %v1404_v34, %v739_v33 }
 0x2fd   :  { %v744_v41 = vadd.f32 %v742_v35, %v738_v36 }
 0x2fe   :  { %v743_v42 = vadd.f32 %v741_v38, %v737_v37 }
 0x2ff   :  { %v746_v18 = vmax.f32 %v744_v41, 0.0 }
 0x300   :  { %1215 = vmatprep.mubr.msk.f32.mxu0 %vm181_vm1, %v743_v42  ;;  %v745_v44 = vmax.f32 %v743_v42, 0.0 }
 0x301   :  { %1216 = vmatmul.mubr.msk.f32.vlgmr.msra.gmra.mrb[4].mxu0 %vm181_vm1, %v744_v41 }
 0x302   :  { %1368 = vmatpush3.bf16.msra.mxu0 %v1365_v12  ;;  %1226 = vmatprep.mubr.msk.f32.mxu0 %vm181_vm1, %v745_v44 }
 0x303   :  { %1370 = vmatprep.subr.bf16.mxu0 %v1369_v43 }
 0x306   :  { %1372 = vmatpush3.bf16.msra.mxu0 %v1369_v43 }
 0x309   :  { %1227 = vmatmul.mubr.msk.f32.vlgmr.msra.gmra.mrb[4].mxu0 %vm181_vm1, %v746_v18 }
 0x3dc   :  { %v1228_v45 = vpop.f32.mrb[4].mxu0 }
 0x3dd   :  { %v925_v46 = vadd.f32 %v1228_v45, %v967_v31  ;;  %v908_v47 = vpop.f32.mrb[5].mxu0 }
 0x3de   :  { %v924_v48 = vadd.f32 %v967_v31, %v908_v47 }
 0x3df   :  { %927 = vst [vmem:[#allocation3 + $0x8] sm:$0xff] %v925_v46 }
 0x3e0   :  { %926 = vst [vmem:[#allocation3] sm:$0xff] %v924_v48 }
 0x3e1   :  { %1416 = shalt.err (!%p1413_p4)
}
 0x3e2   :  { %s1417_s14 = scalar_lea.hbm %s1823_s15, 256 }
 0x3e3   :  { %p1418_p5 = scmp.ne.s32.totalorder %s1823_s15, %s1417_s14  ;;  %p1421_p6 = scmp.lt.u32.totalorder %s1417_s14, %s1823_s15 }
 0x3e5   :  { %p1423_p7 = pnand %p1421_p6, %p1418_p5 }
 0x3e7   :  { %1426 = shalt.err (!%p1423_p7)
}
 0x3e8   :  { %s1431_s8 = smov 128   ;;  %s1432_s26 = smov 8  }
 0x3e9   :  { %939 = dma.vmem_to_hbm [thread:$0]  %s934_s20, 256, %s1823_s15, [#allocation4], %s1431_s8, %s1431_s8, %s1432_s26  }
 0x3ea   :  { %1427 = dma.done.wait [#allocation4], 256  }
 0x3eb   :  { %1428 = vsyncadd [#allocation4], 4294967040 }
 0x3ec   :  { %943 = vsyncpa [#allocation4], 1 }

</bundles_post_ra>
